<compile_context>
chip_gen: v7x
topology: tpu7x:2x2x1
jax: 0.10.0
libtpu: 0.0.40
codegen_flags: <defaults>
</compile_context>

<pallas_src>
import math

import jax
import jax.numpy as jnp
from jax import lax
from jax.experimental import pallas as pl
from jax.experimental.pallas import tpu as pltpu


def _round_up(v, m):
    return ((v + m - 1) // m) * m


def _dense_kernel(x_ref, w_ref, b_ref, o_ref, acc_ref):
    """One (i, j, k) grid step.

    x_ref:   (tm, tk)  activation tile
    w_ref:   (tn, tk)  weight tile, torch (output_dim, input_dim) layout
    b_ref:   (1,  tn)  bias tile
    o_ref:   (tm, tn)  output tile (resident across the k axis)
    acc_ref: (tm, tn)  float32 accumulator scratch
    """
    k = pl.program_id(2)

    @pl.when(k == 0)
    def _():
        acc_ref[...] = jnp.zeros_like(acc_ref)

    # x @ W^T on this tile: contract last dim of x with last dim of W.
    acc_ref[...] += lax.dot_general(
        x_ref[...],
        w_ref[...],
        dimension_numbers=(((1,), (1,)), ((), ())),
        preferred_element_type=jnp.float32,
    )

    @pl.when(k == pl.num_programs(2) - 1)
    def _():
        o_ref[...] = (acc_ref[...] + b_ref[...]).astype(o_ref.dtype)


def dense_forward(x, weight, bias, *, tm=256, tn=256, tk=512):
    """y = x @ weight.T + bias, same semantics as torch.nn.Linear.

    x:      (..., input_dim)
    weight: (output_dim, input_dim)   -- torch Linear convention (not transposed)
    bias:   (output_dim,)
    """
    *lead, input_dim = x.shape
    output_dim, w_in = weight.shape
    assert w_in == input_dim, (w_in, input_dim)

    rows = math.prod(lead) if lead else 1
    x2d = x.reshape(rows, input_dim)

    # Effective tiles: clamp to the (8, 128)-rounded problem so tiny problems
    # run as a single grid step; large problems get MXU-native 256/512 tiles.
    tm_eff = min(tm, _round_up(rows, 8))
    tn_eff = min(tn, _round_up(output_dim, 128))
    tk_eff = min(tk, _round_up(input_dim, 128))

    m_pad = _round_up(rows, tm_eff)
    n_pad = _round_up(output_dim, tn_eff)
    k_pad = _round_up(input_dim, tk_eff)

    # Zero padding: padded K columns are zero in both x and W, so they add
    # nothing to the accumulation; padded M rows / N cols are sliced off below.
    if (m_pad, k_pad) != (rows, input_dim):
        x2d = jnp.pad(x2d, ((0, m_pad - rows), (0, k_pad - input_dim)))
    w2d = weight
    if (n_pad, k_pad) != (output_dim, input_dim):
        w2d = jnp.pad(w2d, ((0, n_pad - output_dim), (0, k_pad - input_dim)))
    b2d = bias.reshape(1, output_dim)
    if n_pad != output_dim:
        b2d = jnp.pad(b2d, ((0, 0), (0, n_pad - output_dim)))

    grid = (m_pad // tm_eff, n_pad // tn_eff, k_pad // tk_eff)

    itemsize = jnp.dtype(x.dtype).itemsize
    cost = pl.CostEstimate(
        flops=2 * m_pad * n_pad * k_pad,
        transcendentals=0,
        bytes_accessed=(m_pad * k_pad + n_pad * k_pad + m_pad * n_pad + n_pad)
        * itemsize,
    )

    out_pad = pl.pallas_call(
        _dense_kernel,
        out_shape=jax.ShapeDtypeStruct((m_pad, n_pad), x.dtype),
        grid=grid,
        in_specs=[
            pl.BlockSpec((tm_eff, tk_eff), lambda i, j, k: (i, k)),   # x
            pl.BlockSpec((tn_eff, tk_eff), lambda i, j, k: (j, k)),   # W (torch layout)
            pl.BlockSpec((1, tn_eff), lambda i, j, k: (0, j)),        # bias
        ],
        out_specs=pl.BlockSpec((tm_eff, tn_eff), lambda i, j, k: (i, j)),
        scratch_shapes=[pltpu.VMEM((tm_eff, tn_eff), jnp.float32)],
        compiler_params=pltpu.CompilerParams(
            dimension_semantics=("parallel", "parallel", "arbitrary"),
            vmem_limit_bytes=32 * 1024 * 1024,
        ),
        cost_estimate=cost,
    )(x2d, w2d, b2d)

    out = out_pad[:rows, :output_dim]
    return out.reshape(*lead, output_dim)


if __name__ == "__main__":
    key = jax.random.PRNGKey(0)
    k_x, k_w, k_b, k_x2, k_w2, k_b2 = jax.random.split(key, 6)

    # --- Small case (typical tiny Dense from the module): single-step grid,
    #     lane-dense padded output.
    input_dim, output_dim = 32, 64
    bound = 1.0 / (input_dim ** 0.5)
    weight = jax.random.uniform(
        k_w, (output_dim, input_dim), jnp.float32, -bound, bound
    )
    bias = jax.random.uniform(k_b, (output_dim,), jnp.float32, -bound, bound)
    x = jax.random.normal(k_x, (2, 4, input_dim), jnp.float32)

    y = dense_forward(x, weight, bias)
    jax.block_until_ready(y)
    y_ref = jnp.einsum("...i,oi->...o", x, weight) + bias
    assert y.shape == (2, 4, output_dim), y.shape
    assert jnp.allclose(y, y_ref, atol=2e-2, rtol=2e-2)

    # --- Larger case: exercises the tiled (M, N, K) grid, the f32 accumulator
    #     and the pl.when init/finalize path (grid = (3, 2, 2)).
    input_dim2, output_dim2 = 1024, 384
    bound2 = 1.0 / (input_dim2 ** 0.5)
    weight2 = jax.random.uniform(
        k_w2, (output_dim2, input_dim2), jnp.float32, -bound2, bound2
    )
    bias2 = jax.random.uniform(k_b2, (output_dim2,), jnp.float32, -bound2, bound2)
    x2 = jax.random.normal(k_x2, (2, 300, input_dim2), jnp.float32)

    y2 = dense_forward(x2, weight2, bias2)
    jax.block_until_ready(y2)
    y2_ref = jnp.einsum("...i,oi->...o", x2, weight2) + bias2
    assert y2.shape == (2, 300, output_dim2), y2.shape
    assert jnp.allclose(y2, y2_ref, atol=2e-2, rtol=2e-2)

    print("KERNEL_OK")
</pallas_src>

<mosaic_0001>
module attributes {stable_mosaic.version = 11 : i64} {
  func.func @_dense_kernel(%arg0: i32, %arg1: i32, %arg2: i32, %arg3: memref<8x128xf32, #tpu.memory_space<vmem>>, %arg4: memref<128x128xf32, #tpu.memory_space<vmem>>, %arg5: memref<1x128xf32, #tpu.memory_space<vmem>>, %arg6: memref<8x128xf32, #tpu.memory_space<vmem>>, %arg7: memref<8x128xf32, #tpu.memory_space<vmem>>) attributes {dimension_semantics = [#tpu.dimension_semantics<parallel>, #tpu.dimension_semantics<parallel>, #tpu.dimension_semantics<arbitrary>], iteration_bounds = array<i64: 1, 1, 1>, scalar_prefetch = 0 : i64, scratch_operands = 1 : i64, tpu.core_type = #tpu.core_type<tc>, window_params = [{transform_indices = @transform_0, window_bounds = array<i64: 8, 128>}, {transform_indices = @transform_1, window_bounds = array<i64: 128, 128>}, {transform_indices = @transform_2, window_bounds = array<i64: 1, 128>}, {transform_indices = @transform_3, window_bounds = array<i64: 8, 128>}]} {
    %c0_i32 = arith.constant 0 : i32
    %0 = arith.cmpi eq, %arg2, %c0_i32 : i32
    %1 = arith.extui %0 : i1 to i32
    %c0_i32_0 = arith.constant 0 : i32
    %2 = arith.cmpi ne, %1, %c0_i32_0 : i32
    scf.if %2 {
      %cst_10 = arith.constant 0.000000e+00 : f32
      %12 = vector.broadcast %cst_10 : f32 to vector<8x128xf32>
      %c0_11 = arith.constant 0 : index
      %c0_12 = arith.constant 0 : index
      %13 = vector.load %arg7[%c0_11, %c0_12] : memref<8x128xf32, #tpu.memory_space<vmem>>, vector<8x128xf32>
      tpu.vector_store %arg7[%c0_11, %c0_12], %12 {strides = array<i32>} : memref<8x128xf32, #tpu.memory_space<vmem>>, vector<8x128xf32>,
    } else {
    }
    %c0 = arith.constant 0 : index
    %c0_1 = arith.constant 0 : index
    %3 = vector.load %arg7[%c0, %c0_1] : memref<8x128xf32, #tpu.memory_space<vmem>>, vector<8x128xf32>
    %c0_2 = arith.constant 0 : index
    %c0_3 = arith.constant 0 : index
    %4 = vector.load %arg3[%c0_2, %c0_3] : memref<8x128xf32, #tpu.memory_space<vmem>>, vector<8x128xf32>
    %c0_4 = arith.constant 0 : index
    %c0_5 = arith.constant 0 : index
    %5 = vector.load %arg4[%c0_4, %c0_5] : memref<128x128xf32, #tpu.memory_space<vmem>>, vector<128x128xf32>
    %cst = arith.constant dense<0.000000e+00> : vector<8x128xf32>
    %6 = tpu.matmul %4, %5, %cst {dimension_numbers = #tpu.dot_dimension_numbers<[1], [1], [0], [0], [0, 0, 1, 0], [], []>} : vector<8x128xf32>, vector<128x128xf32>, vector<8x128xf32> -> vector<8x128xf32>
    %7 = arith.addf %3, %6 : vector<8x128xf32>
    %c0_6 = arith.constant 0 : index
    %c0_7 = arith.constant 0 : index
    %8 = vector.load %arg7[%c0_6, %c0_7] : memref<8x128xf32, #tpu.memory_space<vmem>>, vector<8x128xf32>
    tpu.vector_store %arg7[%c0_6, %c0_7], %7 {strides = array<i32>} : memref<8x128xf32, #tpu.memory_space<vmem>>, vector<8x128xf32>,
    %c0_i32_8 = arith.constant 0 : i32
    %9 = arith.cmpi eq, %arg2, %c0_i32_8 : i32
    %10 = arith.extui %9 : i1 to i32
    %c0_i32_9 = arith.constant 0 : i32
    %11 = arith.cmpi ne, %10, %c0_i32_9 : i32
    scf.if %11 {
      %c0_10 = arith.constant 0 : index
      %c0_11 = arith.constant 0 : index
      %12 = vector.load %arg7[%c0_10, %c0_11] : memref<8x128xf32, #tpu.memory_space<vmem>>, vector<8x128xf32>
      %c0_12 = arith.constant 0 : index
      %c0_13 = arith.constant 0 : index
      %13 = vector.load %arg5[%c0_12, %c0_13] : memref<1x128xf32, #tpu.memory_space<vmem>>, vector<1x128xf32>
      %14 = vector.broadcast %13 : vector<1x128xf32> to vector<8x128xf32>
      %15 = arith.addf %12, %14 : vector<8x128xf32>
      %c0_14 = arith.constant 0 : index
      %c0_15 = arith.constant 0 : index
      %16 = vector.load %arg6[%c0_14, %c0_15] : memref<8x128xf32, #tpu.memory_space<vmem>>, vector<8x128xf32>
      tpu.vector_store %arg6[%c0_14, %c0_15], %15 {strides = array<i32>} : memref<8x128xf32, #tpu.memory_space<vmem>>, vector<8x128xf32>,
    } else {
    }
    return
  }
  func.func @transform_0(%arg0: i32, %arg1: i32, %arg2: i32) -> (i32, i32) {
    %c0_i32 = arith.constant 0 : i32
    return %arg0, %arg2 : i32, i32
  }
  func.func @transform_1(%arg0: i32, %arg1: i32, %arg2: i32) -> (i32, i32) {
    %c0_i32 = arith.constant 0 : i32
    return %arg1, %arg2 : i32, i32
  }
  func.func @transform_2(%arg0: i32, %arg1: i32, %arg2: i32) -> (i32, i32) {
    %c0_i32 = arith.constant 0 : i32
    %c0_i32_0 = arith.constant 0 : i32
    return %c0_i32, %arg1 : i32, i32
  }
  func.func @transform_3(%arg0: i32, %arg1: i32, %arg2: i32) -> (i32, i32) {
    %c0_i32 = arith.constant 0 : i32
    return %arg0, %arg1 : i32, i32
  }
}

</mosaic_0001>

<bundles_post_ra>
// kernel: tpu_custom_call.1
= control target key start
LH: loop header
LB: loop body
LE: loop exit
PB: predicated region body
PF: predicated region fallthrough
CT: control target
= control target key end

     0   :  { %8 = vsyncpa [#allocation4], 0  ;;  %s396_s0 = inlined_call_operand.hbm [shape: f32[8,128], index: 0, kind: input, shape index: {}]   ;;  %s397_s1 = inlined_call_operand.hbm [shape: f32[128,128], index: 1, kind: input, shape index: {}]   ;;  %s398_s2 = inlined_call_operand.vmem [shape: f32[1,128], index: 2, kind: input, shape index: {}]   ;;  %s399_s3 = inlined_call_operand.hbm [shape: f32[8,128], index: 3, kind: output, shape index: {}]  }
   0x1   :  { %9 = vsyncpa [#allocation7], 0 }
   0x2   :  { %10 = vsyncpa [#allocation5], 0  ;;  %s322_s12 = smov [#allocation3]   ;;  %s323_s14 = smov [#allocation6]  }
   0x3   :  { %s17_s13 = sshll.u32 %s322_s12, 4  ;;  %s26_s15 = sshll.u32 %s323_s14, 4  ;;  %s18_s13 = int_to_ptr.vmem [resolvable:$true] %s17_s13  ;;  %s350_s15 = int_to_ptr.vmem [resolvable:$true] %s26_s15 }
   0x4   :  { %s250_s18 = scalar_lea.hbm %s396_s0, 128 }
   0x5   :  { %p251_p0 = scmp.ne.s32.totalorder %s396_s0, %s250_s18  ;;  %p254_p1 = scmp.lt.u32.totalorder %s250_s18, %s396_s0 }
   0x7   :  { %p256_p2 = pnand %p254_p1, %p251_p0 }
   0x9   :  { %259 = shalt.err (!%p256_p2)
}
   0xa   :  { %s260_s23 = scalar_lea.vmem %s18_s13, 128  ;;  %p265_p4 = scmp.lt.s32.totalorder %s18_s13, %s18_s13 }
   0xb   :  { %p261_p3 = scmp.ne.s32.totalorder %s18_s13, %s260_s23  ;;  %p266_p5 = scmp.lt.s32.totalorder %s260_s23, %s260_s23 }
   0xd   :  { %p267_p6 = por %p266_p5, %p265_p4 }
   0xf   :  { %p268_p7 = pnand %p267_p6, %p261_p3 }
  0x11   :  { %271 = shalt.err (!%p268_p7)
}
  0x12   :  { %20 = dma.hbm_to_vmem [thread:$0]  %s396_s0, 128, %s18_s13, [#allocation4]  }
  0x13   :  { %s272_s28 = scalar_lea.hbm %s397_s1, 2048 }
  0x14   :  { %p273_p8 = scmp.ne.s32.totalorder %s397_s1, %s272_s28  ;;  %p276_p9 = scmp.lt.u32.totalorder %s272_s28, %s397_s1 }
  0x16   :  { %p278_p10 = pnand %p276_p9, %p273_p8 }
  0x18   :  { %281 = shalt.err (!%p278_p10)
}
  0x19   :  { %s282_s6 = scalar_lea.vmem %s350_s15, 2048  ;;  %p287_p12 = scmp.lt.s32.totalorder %s350_s15, %s350_s15 }
  0x1a   :  { %p283_p11 = scmp.ne.s32.totalorder %s350_s15, %s282_s6  ;;  %p288_p13 = scmp.lt.s32.totalorder %s282_s6, %s282_s6 }
  0x1c   :  { %p289_p0 = por %p288_p13, %p287_p12 }
  0x1e   :  { %p290_p1 = pnand %p289_p0, %p283_p11 }
  0x20   :  { %293 = shalt.err (!%p290_p1)
}
  0x21   :  { %s324_s0 = smov 128   ;;  %s325_s7 = smov 8  }
  0x22   :  { %32 = dma.hbm_to_vmem [thread:$0]  %s397_s1, 2048, %s350_s15, [#allocation7], %s324_s0, %s324_s0, %s325_s7  }
  0x23   :  { %316 = dma.done.wait [#allocation4], 128  }
  0x24   :  { %317 = vsyncadd [#allocation4], 4294967168 }
  0x25   :  { %318 = dma.done.wait [#allocation7], 2048  }
  0x26   :  { %319 = vsyncadd [#allocation7], 4294965248  ;;  %v326_v0 = vmov 0.0|0.0   ;;  %vm327_vm0 = vmmov 0   ;;  %v328_v1 = vmov 0.0   ;;  %v48_v2 = vld [vmem:[#allocation6] sm:$0xff] }
  0x27   :  { %218 = vmatprep.subr.bf16.mxu0 %v326_v0  ;;  %215 = vmatprep.mubr.msk.f32.mxu0 %vm327_vm0, %v328_v1  ;;  %v49_v3 = vld [vmem:[#allocation6 + $0x8] sm:$0xff]  ;;  %v50_v5 = vld [vmem:[#allocation6 + $0x10] sm:$0xff]  ;;  %v51_v6 = vld [vmem:[#allocation6 + $0x18] sm:$0xff]  ;;  %s329_s11 = smov [#allocation8]  }
  0x28   :  { %v219_v4 = vpack.c.bf16 %v49_v3, %v48_v2  ;;  %v222_v7 = vpack.c.bf16 %v51_v6, %v50_v5  ;;  %v52_v8 = vld [vmem:[#allocation6 + $0x20] sm:$0xff]  ;;  %v53_v9 = vld [vmem:[#allocation6 + $0x28] sm:$0xff]  ;;  %v54_v11 = vld [vmem:[#allocation6 + $0x30] sm:$0xff]  ;;  %s155_s12 = sshll.u32 %s329_s11, 4  ;;  %s156_s12 = int_to_ptr.vmem [resolvable:$true] %s155_s12 }
  0x29   :  { %v225_v10 = vpack.c.bf16 %v53_v9, %v52_v8  ;;  %v55_v12 = vld [vmem:[#allocation6 + $0x38] sm:$0xff]  ;;  %v56_v14 = vld [vmem:[#allocation6 + $0x40] sm:$0xff]  ;;  %v57_v15 = vld [vmem:[#allocation6 + $0x48] sm:$0xff]  ;;  %s294_s13 = scalar_lea.vmem %s156_s12, 128  ;;  %p299_p3 = scmp.lt.s32.totalorder %s156_s12, %s156_s12 }
  0x2a   :  { %220 = vmatpush3.bf16.xpose.msra.mxu0 %v219_v4  ;;  %v228_v13 = vpack.c.bf16 %v55_v12, %v54_v11  ;;  %v231_v16 = vpack.c.bf16 %v57_v15, %v56_v14  ;;  %v58_v17 = vld [vmem:[#allocation6 + $0x50] sm:$0xff]  ;;  %v59_v18 = vld [vmem:[#allocation6 + $0x58] sm:$0xff]  ;;  %v60_v20 = vld [vmem:[#allocation6 + $0x60] sm:$0xff]  ;;  %p295_p2 = scmp.ne.s32.totalorder %s156_s12, %s294_s13  ;;  %p300_p4 = scmp.lt.s32.totalorder %s294_s13, %s294_s13 }
  0x2b   :  { %221 = vmatprep.subr.bf16.mxu0 %v326_v0  ;;  %v234_v19 = vpack.c.bf16 %v59_v18, %v58_v17  ;;  %v61_v21 = vld [vmem:[#allocation6 + $0x68] sm:$0xff]  ;;  %v62_v23 = vld [vmem:[#allocation6 + $0x70] sm:$0xff]  ;;  %v63_v24 = vld [vmem:[#allocation6 + $0x78] sm:$0xff] }
  0x2c   :  { %v237_v22 = vpack.c.bf16 %v61_v21, %v60_v20  ;;  %v240_v25 = vpack.c.bf16 %v63_v24, %v62_v23  ;;  %v47_v26 = vld [vmem:[#allocation3] sm:$0xff]  ;;  %p301_p5 = por %p300_p4, %p299_p3 }
  0x2d   :  { %v165_v27 = vld [vmem:[%s398_s2] ss:$0 sm:$0xff] }
  0x2e   :  { %p302_p6 = pnand %p301_p5, %p295_p2 }
  0x32   :  { %223 = vmatpush3.bf16.xpose.msra.mxu0 %v222_v7 }
  0x33   :  { %224 = vmatprep.subr.bf16.mxu0 %v326_v0 }
  0x3a   :  { %226 = vmatpush3.bf16.xpose.msra.mxu0 %v225_v10 }
  0x3b   :  { %227 = vmatprep.subr.bf16.mxu0 %v326_v0 }
  0x42   :  { %229 = vmatpush3.bf16.xpose.msra.mxu0 %v228_v13 }
  0x43   :  { %230 = vmatprep.subr.bf16.mxu0 %v326_v0 }
  0x4a   :  { %232 = vmatpush3.bf16.xpose.msra.mxu0 %v231_v16 }
  0x4b   :  { %233 = vmatprep.subr.bf16.mxu0 %v326_v0 }
  0x52   :  { %235 = vmatpush3.bf16.xpose.msra.mxu0 %v234_v19 }
  0x53   :  { %236 = vmatprep.subr.bf16.mxu0 %v326_v0 }
  0x5a   :  { %238 = vmatpush3.bf16.xpose.msra.mxu0 %v237_v22 }
  0x5b   :  { %239 = vmatprep.subr.bf16.mxu0 %v326_v0 }
  0x62   :  { %241 = vmatpush3.bf16.xpose.msra.mxu0 %v240_v25 }
  0x69   :  { %216 = vmatmul.mubr.f32.vlgmr.msra.gmra.mrb[0].mxu0 %v47_v26 }
 0x13c   :  { %v130_v28 = vpop.f32.mrb[0].mxu0 }
 0x13d   :  { %v147_v29 = vadd.f32 %v165_v27, %v130_v28  ;;  %v217_v30 = vpop.f32.mrb[1].mxu0 }
 0x13f   :  { %148 = vst [vmem:[#allocation8] sm:$0xff] %v147_v29 }
 0x140   :  { %305 = shalt.err (!%p302_p6)
}
 0x141   :  { %s306_s16 = scalar_lea.hbm %s399_s3, 128 }
 0x142   :  { %p307_p7 = scmp.ne.s32.totalorder %s399_s3, %s306_s16  ;;  %p310_p8 = scmp.lt.u32.totalorder %s306_s16, %s399_s3 }
 0x144   :  { %p312_p9 = pnand %p310_p8, %p307_p7 }
 0x146   :  { %315 = shalt.err (!%p312_p9)
}
 0x147   :  { %158 = dma.vmem_to_hbm [thread:$0]  %s156_s12, 128, %s399_s3, [#allocation5]  }
 0x148   :  { %320 = dma.done.wait [#allocation5], 128  }
 0x149   :  { %321 = vsyncadd [#allocation5], 4294967168 }
 0x14a   :  { %162 = vsyncpa [#allocation4], 1 }
 0x14b   :  { %163 = vsyncpa [#allocation7], 1 }
 0x14c   :  { %164 = vsyncpa [#allocation5], 1 }

</bundles_post_ra>
